<compile_context>
chip_gen: v6e
topology: v6e:2x2x1
jax: 0.10.0
libtpu: 0.0.40
codegen_flags: <defaults>
</compile_context>

<pallas_src>
import functools
import math

import jax
import jax.numpy as jnp
from jax.experimental import pallas as pl
from jax.experimental.pallas import tpu as pltpu

_LANE = 128          # TPU vreg lane width
_BF16_SUBLANE = 16   # bf16 min second-minor tile


def _round_up(x, m):
    return ((x + m - 1) // m) * m


def _mlp_kernel(in_feat, out_feat, x_ref, *refs):
    """Whole MLP forward for one batch tile.

    x_ref : (tb, in_feat) f32            -- unpadded state tile
    refs  : w0, b0, ..., wL, bL, o_ref, xpad_ref
      wi       : (in_pad, out_pad) bf16  -- zero-padded, VMEM-resident across the grid
      bi       : (1, out_pad)      f32   -- zero-padded
      o_ref    : (tb, out_feat)    f32   -- unpadded output tile (narrow masked store)
      xpad_ref : (tb, in_pad)      f32   -- VMEM scratch for in-kernel lane padding
    """
    o_ref = refs[-2]
    xpad_ref = refs[-1]
    param_refs = refs[:-2]
    n_layers = len(param_refs) // 2

    # Lane-pad the input inside the kernel.  Padded lanes must be exactly zero so they
    # contribute nothing through the zero-padded weight rows.  Re-zero every grid step:
    # with dimension_semantics=("parallel",) each v7x TensorCore has its own scratch, so
    # an "init only at program_id==0" scheme would leave one core's pad lanes dirty.
    xpad_ref[...] = jnp.zeros_like(xpad_ref)
    xpad_ref[:, :in_feat] = x_ref[...]
    h = xpad_ref[...]                                    # (tb, in_pad) f32

    for i in range(n_layers):
        w = param_refs[2 * i][...]                       # bf16 (in_pad, out_pad)
        b = param_refs[2 * i + 1][...]                   # f32  (1, out_pad)
        acc = jnp.dot(h.astype(w.dtype), w, preferred_element_type=jnp.float32)
        if i < n_layers - 1:
            h = jnp.maximum(acc + b, 0.0)                # hidden: ReLU (relu(relu(x)) == relu(x))
        else:
            # Slice to the real output columns before the (EUP) tanh and the store.
            y = jnp.tanh(acc[:, :out_feat] + b[:, :out_feat])
            o_ref[...] = y.astype(o_ref.dtype)


def init_params(key, input_size, hidden_layers, output_size):
    """Deterministic synthetic parameters, PyTorch-Linear-like uniform init.

    Weights are stored as [in, out] (already transposed vs. torch's [out, in]).
    Biases are stored as [1, out].
    """
    dims = [input_size] + list(hidden_layers) + [output_size]
    params = []
    for i in range(len(dims) - 1):
        fan_in, fan_out = dims[i], dims[i + 1]
        key, kw, kb = jax.random.split(key, 3)
        bound = 1.0 / math.sqrt(fan_in)
        w = jax.random.uniform(kw, (fan_in, fan_out), jnp.float32, -bound, bound)
        b = jax.random.uniform(kb, (1, fan_out), jnp.float32, -bound, bound)
        params.append((w, b))
    return params


def prepare_params(params):
    """Zero-pad every layer's feature dims to 128 lanes; weights -> bf16, biases stay f32.

    Padded weight rows/cols and padded bias entries are zero, so padded activation lanes
    stay exactly zero through every hidden layer (relu(0) = 0); the final layer's extra
    columns are sliced off inside the kernel before tanh.  Total padded param footprint is
    ~100 KiB and is DMA'd once (constant index_map) -> negligible.
    """
    padded = []
    for w, b in params:
        fan_in, fan_out = w.shape
        in_p = _round_up(fan_in, _LANE)
        out_p = _round_up(fan_out, _LANE)
        w_p = jnp.zeros((in_p, out_p), jnp.float32).at[:fan_in, :fan_out].set(w)
        b_p = jnp.zeros((1, out_p), jnp.float32).at[:, :fan_out].set(b)
        padded.append((w_p.astype(jnp.bfloat16), b_p))
    return padded


def _pick_tile(batch, block_batch):
    """Batch tile: multiple of 16 (bf16 LHS tile), capped by batch, >=2 steps for big batches."""
    block_batch = max(_BF16_SUBLANE, _round_up(block_batch, _BF16_SUBLANE))
    tb = min(block_batch, _round_up(batch, _BF16_SUBLANE))
    if batch >= 64:
        # Guarantee at least two grid steps so v7x's two TensorCores both get work
        # (harmless extra step on single-TC v5e/v6e).
        half = _round_up(pl.cdiv(batch, 2), _BF16_SUBLANE)
        tb = min(tb, half)
    return tb


@functools.partial(jax.jit, static_argnames=("output_size", "block_batch"))
def network_forward(state, padded_params, output_size, block_batch=1024):
    """Run the whole MLP in a single Pallas kernel, tiled over the batch dimension."""
    batch, in_feat = state.shape
    in_pad = padded_params[0][0].shape[0]

    tb = _pick_tile(batch, block_batch)
    grid = (pl.cdiv(batch, tb),)   # partial last block handled by Pallas masking

    flat_inputs = [state]
    in_specs = [pl.BlockSpec((tb, in_feat), lambda i: (i, 0))]
    for w, b in padded_params:
        flat_inputs.append(w)
        flat_inputs.append(b)
        # Parameters: whole array, constant index_map -> single DMA, VMEM-resident.
        in_specs.append(pl.BlockSpec(w.shape, lambda i: (0, 0)))
        in_specs.append(pl.BlockSpec(b.shape, lambda i: (0, 0)))
    out_specs = pl.BlockSpec((tb, output_size), lambda i: (i, 0))

    param_bytes = sum(int(w.size) * w.dtype.itemsize + int(b.size) * b.dtype.itemsize
                      for w, b in padded_params)
    flops = 2 * batch * sum(int(w.shape[0]) * int(w.shape[1]) for w, _ in padded_params)
    bytes_accessed = (batch * in_feat * 4            # unpadded input read
                      + param_bytes                  # params fetched once
                      + batch * output_size * 4)     # unpadded output write

    kernel = functools.partial(_mlp_kernel, in_feat, output_size)

    return pl.pallas_call(
        kernel,
        out_shape=jax.ShapeDtypeStruct((batch, output_size), jnp.float32),
        grid=grid,
        in_specs=in_specs,
        out_specs=out_specs,
        scratch_shapes=[pltpu.VMEM((tb, in_pad), jnp.float32)],
        compiler_params=pltpu.CompilerParams(
            dimension_semantics=("parallel",)),   # shard batch axis across v7x's 2 TCs
        cost_estimate=pl.CostEstimate(
            flops=flops,
            transcendentals=batch * output_size,
            bytes_accessed=bytes_accessed),
    )(*flat_inputs)


def reference_forward_mixed(state, padded_params, output_size):
    """Pure-JAX reference with the same bf16-matmul / f32-accumulate recipe as the kernel."""
    in_pad = padded_params[0][0].shape[0]
    h = jnp.zeros((state.shape[0], in_pad), jnp.float32).at[:, :state.shape[1]].set(state)
    for i, (w, b) in enumerate(padded_params):
        acc = jnp.dot(h.astype(jnp.bfloat16), w, preferred_element_type=jnp.float32) + b
        if i < len(padded_params) - 1:
            h = jnp.maximum(acc, 0.0)
        else:
            h = jnp.tanh(acc)
    return h[:, :output_size]


def reference_forward_f32(state, params):
    """Full-f32 reference matching the PyTorch forward exactly."""
    h = state
    for i, (w, b) in enumerate(params):
        h = h @ w + b
        if i < len(params) - 1:
            h = jnp.maximum(h, 0.0)
        else:
            h = jnp.tanh(h)
    return h


if __name__ == "__main__":
    # Cartpole-like sizes: input_size=4 (state), two hidden layers of 32, output_size=2.
    input_size = 4
    hidden_layers = [32, 32]
    output_size = 2
    batch = 8   # not a multiple of the 16-row tile -> exercises the masked partial block

    key = jax.random.PRNGKey(0)
    key, k_state = jax.random.split(key)
    state = jax.random.normal(k_state, (batch, input_size), dtype=jnp.float32)
    params = init_params(key, input_size, hidden_layers, output_size)
    padded_params = prepare_params(params)

    out = network_forward(state, padded_params, output_size=output_size)
    out = jax.block_until_ready(out)
    assert out.shape == (batch, output_size)

    # Exact-recipe check (same bf16 matmul inputs, f32 accumulation).
    ref_mixed = reference_forward_mixed(state, padded_params, output_size)
    assert jnp.allclose(out, ref_mixed, atol=1e-4, rtol=1e-4), \
        "Pallas output mismatch vs mixed-precision reference"

    # Semantic check vs the full-f32 PyTorch-equivalent forward (bf16-weight tolerance).
    ref_f32 = reference_forward_f32(state, params)
    assert jnp.allclose(out, ref_f32, atol=5e-2, rtol=5e-2), \
        "Pallas output mismatch vs f32 reference"

    print("KERNEL_OK")
</pallas_src>

<mosaic_0001>
module attributes {stable_mosaic.version = 11 : i64} {
  func.func @_mlp_kernel(%arg0: i32, %arg1: memref<16x4xf32, #tpu.memory_space<vmem>>, %arg2: memref<128x128xbf16, #tpu.memory_space<vmem>>, %arg3: memref<1x128xf32, #tpu.memory_space<vmem>>, %arg4: memref<128x128xbf16, #tpu.memory_space<vmem>>, %arg5: memref<1x128xf32, #tpu.memory_space<vmem>>, %arg6: memref<128x128xbf16, #tpu.memory_space<vmem>>, %arg7: memref<1x128xf32, #tpu.memory_space<vmem>>, %arg8: memref<16x2xf32, #tpu.memory_space<vmem>>, %arg9: memref<16x128xf32, #tpu.memory_space<vmem>>) attributes {dimension_semantics = [#tpu.dimension_semantics<parallel>], iteration_bounds = array<i64: 1>, scalar_prefetch = 0 : i64, scratch_operands = 1 : i64, tpu.core_type = #tpu.core_type<tc>, window_params = [{transform_indices = @transform_0, window_bounds = array<i64: 16, 4>}, {pipeline_mode = #tpu.pipeline_mode<synchronous>, transform_indices = @transform_1, window_bounds = array<i64: 128, 128>}, {pipeline_mode = #tpu.pipeline_mode<synchronous>, transform_indices = @transform_2, window_bounds = array<i64: 1, 128>}, {pipeline_mode = #tpu.pipeline_mode<synchronous>, transform_indices = @transform_3, window_bounds = array<i64: 128, 128>}, {pipeline_mode = #tpu.pipeline_mode<synchronous>, transform_indices = @transform_4, window_bounds = array<i64: 1, 128>}, {pipeline_mode = #tpu.pipeline_mode<synchronous>, transform_indices = @transform_5, window_bounds = array<i64: 128, 128>}, {pipeline_mode = #tpu.pipeline_mode<synchronous>, transform_indices = @transform_6, window_bounds = array<i64: 1, 128>}, {transform_indices = @transform_7, window_bounds = array<i64: 16, 2>}]} {
    %cst = arith.constant 0.000000e+00 : f32
    %0 = vector.broadcast %cst : f32 to vector<16x128xf32>
    %c0 = arith.constant 0 : index
    %c0_0 = arith.constant 0 : index
    %1 = vector.load %arg9[%c0, %c0_0] : memref<16x128xf32, #tpu.memory_space<vmem>>, vector<16x128xf32>
    tpu.vector_store %arg9[%c0, %c0_0], %0 {strides = array<i32>} : memref<16x128xf32, #tpu.memory_space<vmem>>, vector<16x128xf32>,
    %c0_1 = arith.constant 0 : index
    %c0_2 = arith.constant 0 : index
    %2 = vector.load %arg1[%c0_1, %c0_2] : memref<16x4xf32, #tpu.memory_space<vmem>>, vector<16x4xf32>
    %c0_3 = arith.constant 0 : index
    %c0_4 = arith.constant 0 : index
    %3 = vector.load %arg9[%c0_3, %c0_4] : memref<16x128xf32, #tpu.memory_space<vmem>>, vector<16x4xf32>
    tpu.vector_store %arg9[%c0_3, %c0_4], %2 {strides = array<i32>} : memref<16x128xf32, #tpu.memory_space<vmem>>, vector<16x4xf32>,
    %c0_5 = arith.constant 0 : index
    %c0_6 = arith.constant 0 : index
    %4 = vector.load %arg9[%c0_5, %c0_6] : memref<16x128xf32, #tpu.memory_space<vmem>>, vector<16x128xf32>
    %c0_7 = arith.constant 0 : index
    %c0_8 = arith.constant 0 : index
    %5 = vector.load %arg2[%c0_7, %c0_8] : memref<128x128xbf16, #tpu.memory_space<vmem>>, vector<128x128xbf16>
    %c0_9 = arith.constant 0 : index
    %c0_10 = arith.constant 0 : index
    %6 = vector.load %arg3[%c0_9, %c0_10] : memref<1x128xf32, #tpu.memory_space<vmem>>, vector<1x128xf32>
    %7 = arith.truncf %4 : vector<16x128xf32> to vector<16x128xbf16>
    %cst_11 = arith.constant dense<0.000000e+00> : vector<16x128xf32>
    %8 = tpu.matmul %7, %5, %cst_11 {dimension_numbers = #tpu.dot_dimension_numbers<[1], [0], [0], [1], [0, 0, 1, 1], [], []>} : vector<16x128xbf16>, vector<128x128xbf16>, vector<16x128xf32> -> vector<16x128xf32>
    %9 = vector.broadcast %6 : vector<1x128xf32> to vector<16x128xf32>
    %10 = arith.addf %8, %9 : vector<16x128xf32>
    %cst_12 = arith.constant 0.000000e+00 : f32
    %11 = vector.broadcast %cst_12 : f32 to vector<16x128xf32>
    %12 = arith.maximumf %10, %11 : vector<16x128xf32>
    %c0_13 = arith.constant 0 : index
    %c0_14 = arith.constant 0 : index
    %13 = vector.load %arg4[%c0_13, %c0_14] : memref<128x128xbf16, #tpu.memory_space<vmem>>, vector<128x128xbf16>
    %c0_15 = arith.constant 0 : index
    %c0_16 = arith.constant 0 : index
    %14 = vector.load %arg5[%c0_15, %c0_16] : memref<1x128xf32, #tpu.memory_space<vmem>>, vector<1x128xf32>
    %15 = arith.truncf %12 : vector<16x128xf32> to vector<16x128xbf16>
    %cst_17 = arith.constant dense<0.000000e+00> : vector<16x128xf32>
    %16 = tpu.matmul %15, %13, %cst_17 {dimension_numbers = #tpu.dot_dimension_numbers<[1], [0], [0], [1], [0, 0, 1, 1], [], []>} : vector<16x128xbf16>, vector<128x128xbf16>, vector<16x128xf32> -> vector<16x128xf32>
    %17 = vector.broadcast %14 : vector<1x128xf32> to vector<16x128xf32>
    %18 = arith.addf %16, %17 : vector<16x128xf32>
    %cst_18 = arith.constant 0.000000e+00 : f32
    %19 = vector.broadcast %cst_18 : f32 to vector<16x128xf32>
    %20 = arith.maximumf %18, %19 : vector<16x128xf32>
    %c0_19 = arith.constant 0 : index
    %c0_20 = arith.constant 0 : index
    %21 = vector.load %arg6[%c0_19, %c0_20] : memref<128x128xbf16, #tpu.memory_space<vmem>>, vector<128x128xbf16>
    %c0_21 = arith.constant 0 : index
    %c0_22 = arith.constant 0 : index
    %22 = vector.load %arg7[%c0_21, %c0_22] : memref<1x128xf32, #tpu.memory_space<vmem>>, vector<1x128xf32>
    %23 = arith.truncf %20 : vector<16x128xf32> to vector<16x128xbf16>
    %cst_23 = arith.constant dense<0.000000e+00> : vector<16x128xf32>
    %24 = tpu.matmul %23, %21, %cst_23 {dimension_numbers = #tpu.dot_dimension_numbers<[1], [0], [0], [1], [0, 0, 1, 1], [], []>} : vector<16x128xbf16>, vector<128x128xbf16>, vector<16x128xf32> -> vector<16x128xf32>
    %25 = vector.extract_strided_slice %24 {offsets = [0, 0], sizes = [16, 2], strides = [1, 1]} : vector<16x128xf32> to vector<16x2xf32>
    %26 = vector.extract_strided_slice %22 {offsets = [0, 0], sizes = [1, 2], strides = [1, 1]} : vector<1x128xf32> to vector<1x2xf32>
    %27 = vector.broadcast %26 : vector<1x2xf32> to vector<16x2xf32>
    %28 = arith.addf %25, %27 : vector<16x2xf32>
    %29 = math.tanh %28 : vector<16x2xf32>
    %c0_24 = arith.constant 0 : index
    %c0_25 = arith.constant 0 : index
    %30 = vector.load %arg8[%c0_24, %c0_25] : memref<16x2xf32, #tpu.memory_space<vmem>>, vector<16x2xf32>
    tpu.vector_store %arg8[%c0_24, %c0_25], %29 {strides = array<i32>} : memref<16x2xf32, #tpu.memory_space<vmem>>, vector<16x2xf32>,
    return
  }
  func.func @transform_0(%arg0: i32) -> (i32, i32) {
    %c0_i32 = arith.constant 0 : i32
    %c0_i32_0 = arith.constant 0 : i32
    return %arg0, %c0_i32 : i32, i32
  }
  func.func @transform_1(%arg0: i32) -> (i32, i32) {
    %c0_i32 = arith.constant 0 : i32
    %c0_i32_0 = arith.constant 0 : i32
    %c0_i32_1 = arith.constant 0 : i32
    return %c0_i32, %c0_i32_0 : i32, i32
  }
  func.func @transform_2(%arg0: i32) -> (i32, i32) {
    %c0_i32 = arith.constant 0 : i32
    %c0_i32_0 = arith.constant 0 : i32
    %c0_i32_1 = arith.constant 0 : i32
    return %c0_i32, %c0_i32_0 : i32, i32
  }
  func.func @transform_3(%arg0: i32) -> (i32, i32) {
    %c0_i32 = arith.constant 0 : i32
    %c0_i32_0 = arith.constant 0 : i32
    %c0_i32_1 = arith.constant 0 : i32
    return %c0_i32, %c0_i32_0 : i32, i32
  }
  func.func @transform_4(%arg0: i32) -> (i32, i32) {
    %c0_i32 = arith.constant 0 : i32
    %c0_i32_0 = arith.constant 0 : i32
    %c0_i32_1 = arith.constant 0 : i32
    return %c0_i32, %c0_i32_0 : i32, i32
  }
  func.func @transform_5(%arg0: i32) -> (i32, i32) {
    %c0_i32 = arith.constant 0 : i32
    %c0_i32_0 = arith.constant 0 : i32
    %c0_i32_1 = arith.constant 0 : i32
    return %c0_i32, %c0_i32_0 : i32, i32
  }
  func.func @transform_6(%arg0: i32) -> (i32, i32) {
    %c0_i32 = arith.constant 0 : i32
    %c0_i32_0 = arith.constant 0 : i32
    %c0_i32_1 = arith.constant 0 : i32
    return %c0_i32, %c0_i32_0 : i32, i32
  }
  func.func @transform_7(%arg0: i32) -> (i32, i32) {
    %c0_i32 = arith.constant 0 : i32
    %c0_i32_0 = arith.constant 0 : i32
    return %arg0, %c0_i32 : i32, i32
  }
}

</mosaic_0001>

<bundles_post_ra>
// kernel: network_forward.1
= control target key start
LH: loop header
LB: loop body
LE: loop exit
PB: predicated region body
PF: predicated region fallthrough
CT: control target
= control target key end

     0   :  { %12 = vsyncpa [#allocation4], 0  ;;  %s789_s0 = inlined_call_operand.vmem [shape: f32[8,4], index: 0, kind: input, shape index: {}]   ;;  %s790_s1 = inlined_call_operand.hbm [shape: bf16[128,128], index: 1, kind: input, shape index: {}]   ;;  %s791_s2 = inlined_call_operand.vmem [shape: f32[1,128], index: 2, kind: input, shape index: {}]   ;;  %s792_s3 = inlined_call_operand.hbm [shape: bf16[128,128], index: 3, kind: input, shape index: {}]   ;;  %s793_s4 = inlined_call_operand.vmem [shape: f32[1,128], index: 4, kind: input, shape index: {}]   ;;  %s794_s5 = inlined_call_operand.hbm [shape: bf16[128,128], index: 5, kind: input, shape index: {}]   ;;  %s795_s6 = inlined_call_operand.vmem [shape: f32[1,128], index: 6, kind: input, shape index: {}]   ;;  %s796_s7 = inlined_call_operand.vmem [shape: f32[8,2], index: 7, kind: output, shape index: {}]  }
   0x1   :  { %13 = vsyncpa [#allocation6], 0  ;;  %s683_s24 = smov [#allocation5]   ;;  %s684_s26 = smov [#allocation3]  }
   0x2   :  { %s35_s25 = sshll.u32 %s683_s24, 4  ;;  %s21_s27 = sshll.u32 %s684_s26, 4  ;;  %s36_s25 = int_to_ptr.vmem [resolvable:$true] %s35_s25  ;;  %s22_s27 = int_to_ptr.vmem [resolvable:$true] %s21_s27 }
   0x3   :  { %s627_s28 = scalar_lea.vmem %s36_s25, 1024  ;;  %p632_p1 = scmp.lt.s32.totalorder %s36_s25, %s36_s25 }
   0x4   :  { %p628_p0 = scmp.ne.s32.totalorder %s36_s25, %s627_s28  ;;  %p633_p2 = scmp.lt.s32.totalorder %s627_s28, %s627_s28 }
   0x6   :  { %p634_p3 = por %p633_p2, %p632_p1 }
   0x8   :  { %p635_p4 = pnand %p634_p3, %p628_p0 }
   0xa   :  { %638 = shalt.err (!%p635_p4)
}
   0xb   :  { %s685_s29 = smov 64   ;;  %s686_s30 = smov 4  }
   0xc   :  { %41 = dma.hbm_to_vmem [thread:$0]  %s792_s3, 1024, %s36_s25, [#allocation6], %s685_s29, %s685_s29, %s686_s30  }
   0xd   :  { %s647_s10 = scalar_lea.vmem %s22_s27, 1024  ;;  %p652_p6 = scmp.lt.s32.totalorder %s22_s27, %s22_s27 }
   0xe   :  { %p648_p5 = scmp.ne.s32.totalorder %s22_s27, %s647_s10  ;;  %p653_p7 = scmp.lt.s32.totalorder %s647_s10, %s647_s10 }
  0x10   :  { %p654_p8 = por %p653_p7, %p652_p6 }
  0x12   :  { %p655_p9 = pnand %p654_p8, %p648_p5 }
  0x14   :  { %658 = shalt.err (!%p655_p9)
}
  0x15   :  { %27 = dma.hbm_to_vmem [thread:$0]  %s790_s1, 1024, %s22_s27, [#allocation4], %s685_s29, %s685_s29, %s686_s30  }
  0x16   :  { %s687_s13 = smov [#allocation7]  }
  0x17   :  { %s49_s14 = sshll.u32 %s687_s13, 4  ;;  %s50_s14 = int_to_ptr.vmem [resolvable:$true] %s49_s14 }
  0x18   :  { %s667_s15 = scalar_lea.vmem %s50_s14, 1024  ;;  %p672_p11 = scmp.lt.s32.totalorder %s50_s14, %s50_s14 }
  0x19   :  { %p668_p10 = scmp.ne.s32.totalorder %s50_s14, %s667_s15  ;;  %p673_p12 = scmp.lt.s32.totalorder %s667_s15, %s667_s15 }
  0x1b   :  { %p674_p13 = por %p673_p12, %p672_p11 }
  0x1d   :  { %p675_p0 = pnand %p674_p13, %p668_p10 }
  0x1f   :  { %678 = shalt.err (!%p675_p0)
}
  0x20   :  { %55 = dma.hbm_to_vmem [thread:$0]  %s794_s5, 1024, %s50_s14, [#allocation6], %s685_s29, %s685_s29, %s686_s30  }
  0x21   :  { %679 = dma.done.wait [#allocation4], 1024  }
  0x22   :  { %680 = vsyncadd [#allocation4], 4294966272 }
  0x23   :  { %681 = dma.done.wait [#allocation6], 2048  }
  0x24   :  { %682 = vsyncadd [#allocation6], 4294965248  ;;  %v688_v0 = vmov 0.0   ;;  %vm689_vm0 = vmmov 0   ;;  %v591_v1 = vld [vmem:[#allocation3 + $0x38] sm:$0xff]   ;;  %v592_v2 = vld [vmem:[#allocation3 + $0x30] sm:$0xff]  }
  0x25   :  { %524 = vmatprep.subr.bf16.mxu0 %v688_v0  ;;  %68 = vst [vmem:[#allocation2] sm:$0xff] %v688_v0  ;;  %69 = vst [vmem:[#allocation2 + $0x8] sm:$0xff] %v688_v0  ;;  %540 = vmatprep.mubr.msk.bf16.mxu0 %vm689_vm0, %v688_v0  ;;  %v593_v3 = vld [vmem:[#allocation3 + $0x28] sm:$0xff]   ;;  %vm72_vm1 = vcmask 31744   ;;  %v70_v4 = vld [vmem:[%s789_s0] sm:$0xff]  ;;  %vm424_vm2 = vcmask 15360  }
  0x26   :  { %544 = vmatprep.subr.bf16.mxu1 %v688_v0  ;;  %560 = vmatprep.mubr.msk.bf16.mxu1 %vm689_vm0, %v688_v0  ;;  %v71_v5 = vld [vmem:[%s789_s0 + $0x8] sm:$0xff]  ;;  %73 = vst.msk [vmem:[#allocation2] sm:$0xff] %vm72_vm1, %v70_v4  ;;  %v594_v7 = vld [vmem:[#allocation3 + $0x20] sm:$0xff]   ;;  %v600_v8 = vld [vmem:[#allocation5 + $0x30] sm:$0xff]  }
  0x27   :  { %525 = vmatpush3.bf16.msra.mxu0 %v591_v1  ;;  %74 = vst.msk [vmem:[#allocation2 + $0x8] sm:$0xff] %vm72_vm1, %v71_v5  ;;  %v599_v6 = vld [vmem:[#allocation5 + $0x38] sm:$0xff]   ;;  %v601_v10 = vld [vmem:[#allocation5 + $0x28] sm:$0xff]   ;;  %v596_v11 = vld [vmem:[#allocation3 + $0x10] sm:$0xff]  }
  0x28   :  { %526 = vmatprep.subr.bf16.mxu0 %v688_v0  ;;  %545 = vmatpush3.bf16.msra.mxu1 %v599_v6  ;;  %v595_v9 = vld [vmem:[#allocation3 + $0x18] sm:$0xff]   ;;  %v602_v12 = vld [vmem:[#allocation5 + $0x20] sm:$0xff]   ;;  %v597_v13 = vld [vmem:[#allocation3 + $0x8] sm:$0xff]  }
  0x29   :  { %546 = vmatprep.subr.bf16.mxu1 %v688_v0  ;;  %v603_v14 = vld [vmem:[#allocation5 + $0x18] sm:$0xff]   ;;  %v598_v15 = vld [vmem:[#allocation3] sm:$0xff]   ;;  %v604_v19 = vld [vmem:[#allocation5 + $0x10] sm:$0xff]  }
  0x2a   :  { %v605_v20 = vld [vmem:[#allocation5 + $0x8] sm:$0xff]   ;;  %v606_v21 = vld [vmem:[#allocation5] sm:$0xff]   ;;  %v607_v22 = vld [vmem:[#allocation7 + $0x38] sm:$0xff]  }
  0x2b   :  { %527 = vmatpush3.bf16.msra.mxu0 %v592_v2  ;;  %v608_v23 = vld [vmem:[#allocation7 + $0x30] sm:$0xff]   ;;  %v609_v24 = vld [vmem:[#allocation7 + $0x28] sm:$0xff]   ;;  %v610_v25 = vld [vmem:[#allocation7 + $0x20] sm:$0xff]  }
  0x2c   :  { %528 = vmatprep.subr.bf16.mxu0 %v688_v0  ;;  %547 = vmatpush3.bf16.msra.mxu1 %v600_v8  ;;  %v611_v26 = vld [vmem:[#allocation7 + $0x18] sm:$0xff]   ;;  %v470_v27 = vld [vmem:[%s791_s2] ss:$0 sm:$0xff]  ;;  %v613_v38 = vld [vmem:[#allocation7 + $0x8] sm:$0xff]  }
  0x2d   :  { %548 = vmatprep.subr.bf16.mxu1 %v688_v0  ;;  %v75_v16 = vld [vmem:[#allocation2] sm:$0xff]  ;;  %v614_v39 = vld [vmem:[#allocation7] sm:$0xff]  }
  0x2e   :  { %v76_v17 = vld [vmem:[#allocation2 + $0x8] sm:$0xff]  ;;  %v612_v37 = vld [vmem:[#allocation7 + $0x10] sm:$0xff]  }
  0x2f   :  { %529 = vmatpush3.bf16.msra.mxu0 %v593_v3  ;;  %v94_v18 = vpack.c.bf16 %v76_v17, %v75_v16  ;;  %v479_v40 = vld [vmem:[%s793_s4] ss:$0 sm:$0xff] }
  0x30   :  { %530 = vmatprep.subr.bf16.mxu0 %v688_v0  ;;  %549 = vmatpush3.bf16.msra.mxu1 %v601_v10  ;;  %v496_v50 = vld [vmem:[%s795_s6] ss:$0 sm:$0xff] }
  0x31   :  { %550 = vmatprep.subr.bf16.mxu1 %v688_v0 }
  0x33   :  { %531 = vmatpush3.bf16.msra.mxu0 %v594_v7 }
  0x34   :  { %532 = vmatprep.subr.bf16.mxu0 %v688_v0  ;;  %551 = vmatpush3.bf16.msra.mxu1 %v602_v12 }
  0x35   :  { %552 = vmatprep.subr.bf16.mxu1 %v688_v0 }
  0x37   :  { %533 = vmatpush3.bf16.msra.mxu0 %v595_v9 }
  0x38   :  { %534 = vmatprep.subr.bf16.mxu0 %v688_v0  ;;  %553 = vmatpush3.bf16.msra.mxu1 %v603_v14 }
  0x39   :  { %554 = vmatprep.subr.bf16.mxu1 %v688_v0 }
  0x3b   :  { %535 = vmatpush3.bf16.msra.mxu0 %v596_v11 }
  0x3c   :  { %536 = vmatprep.subr.bf16.mxu0 %v688_v0  ;;  %555 = vmatpush3.bf16.msra.mxu1 %v604_v19 }
  0x3d   :  { %556 = vmatprep.subr.bf16.mxu1 %v688_v0 }
  0x3f   :  { %537 = vmatpush3.bf16.msra.mxu0 %v597_v13 }
  0x40   :  { %538 = vmatprep.subr.bf16.mxu0 %v688_v0  ;;  %557 = vmatpush3.bf16.msra.mxu1 %v605_v20 }
  0x41   :  { %558 = vmatprep.subr.bf16.mxu1 %v688_v0 }
  0x43   :  { %539 = vmatpush3.bf16.msra.mxu0 %v598_v15 }
  0x44   :  { %564 = vmatprep.subr.bf16.mxu0 %v688_v0  ;;  %559 = vmatpush3.bf16.msra.mxu1 %v606_v21 }
  0x46   :  { %541 = vmatmul.mubr.bf16.vlgmr.msra.gmra.mxu0 %v94_v18 }
  0x47   :  { %580 = vmatprep.mubr.msk.bf16.mxu0 %vm689_vm0, %v688_v0  ;;  %565 = vmatpush3.bf16.msra.mxu0 %v607_v22 }
  0x48   :  { %566 = vmatprep.subr.bf16.mxu0 %v688_v0 }
  0x4b   :  { %567 = vmatpush3.bf16.msra.mxu0 %v608_v23 }
  0x4c   :  { %568 = vmatprep.subr.bf16.mxu0 %v688_v0 }
  0x4f   :  { %569 = vmatpush3.bf16.msra.mxu0 %v609_v24 }
  0x50   :  { %570 = vmatprep.subr.bf16.mxu0 %v688_v0 }
  0x53   :  { %571 = vmatpush3.bf16.msra.mxu0 %v610_v25 }
  0x54   :  { %572 = vmatprep.subr.bf16.mxu0 %v688_v0 }
  0x57   :  { %573 = vmatpush3.bf16.msra.mxu0 %v611_v26 }
  0x58   :  { %574 = vmatprep.subr.bf16.mxu0 %v688_v0 }
  0x5b   :  { %575 = vmatpush3.bf16.msra.mxu0 %v612_v37 }
  0x5c   :  { %576 = vmatprep.subr.bf16.mxu0 %v688_v0 }
  0x5f   :  { %577 = vmatpush3.bf16.msra.mxu0 %v613_v38 }
  0x60   :  { %578 = vmatprep.subr.bf16.mxu0 %v688_v0 }
  0x63   :  { %579 = vmatpush3.bf16.msra.mxu0 %v614_v39 }
 0x106   :  { %v183_v28 = vpop.f32.mrf.mxu0 }
 0x107   :  { %v184_v30 = vadd.f32 %v470_v27, %v183_v28 }
 0x108   :  { %v542_v29 = vpop.f32.mrf.mxu0 }
 0x109   :  { %v190_v34 = vmax.f32 %v184_v30, 0.0 }
 0x10a   :  { %v186_v31 = vpop.f32.mrf.mxu0 }
 0x10b   :  { %v187_v32 = vadd.f32 %v470_v27, %v186_v31 }
 0x10c   :  { %v543_v33 = vpop.f32.mrf.mxu0 }
 0x10d   :  { %v191_v35 = vmax.f32 %v187_v32, 0.0 }
 0x10f   :  { %v209_v36 = vpack.c.bf16 %v191_v35, %v190_v34 }
 0x111   :  { %561 = vmatmul.mubr.bf16.vlgmr.msra.gmra.mxu1 %v209_v36 }
 0x1d1   :  { %v298_v41 = vpop.f32.mrf.mxu1 }
 0x1d2   :  { %v299_v43 = vadd.f32 %v479_v40, %v298_v41 }
 0x1d3   :  { %v562_v42 = vpop.f32.mrf.mxu1 }
 0x1d4   :  { %v305_v47 = vmax.f32 %v299_v43, 0.0 }
 0x1d5   :  { %v301_v44 = vpop.f32.mrf.mxu1 }
 0x1d6   :  { %v302_v45 = vadd.f32 %v479_v40, %v301_v44 }
 0x1d7   :  { %v563_v46 = vpop.f32.mrf.mxu1 }
 0x1d8   :  { %v306_v48 = vmax.f32 %v302_v45, 0.0 }
 0x1da   :  { %v324_v49 = vpack.c.bf16 %v306_v48, %v305_v47 }
 0x1dc   :  { %581 = vmatmul.mubr.bf16.vlgmr.msra.gmra.mxu0 %v324_v49 }
 0x29c   :  { %v407_v51 = vpop.f32.mrf.mxu0 }
 0x29d   :  { %v420_v52 = vadd.f32 %v496_v50, %v407_v51 }
 0x29e   :  { %v582_v53 = vpop.f32.mrf.mxu0 }
 0x29f   :  { %615 = vtanh.f32 %v420_v52 }
 0x2a0   :  { %v410_v54 = vpop.f32.mrf.mxu0 }
 0x2a1   :  { %v421_v55 = vadd.f32 %v496_v50, %v410_v54 }
 0x2a2   :  { %v583_v56 = vpop.f32.mrf.mxu0 }
 0x2a3   :  { %617 = vtanh.f32 %v421_v55 }
 0x2ac   :  { %v616_v57 = vpop.eup %615 }
 0x2ad   :  { %425 = vst.msk [vmem:[#allocation8] sm:$0xff] %vm424_vm2, %v616_v57 }
 0x2b0   :  { %v618_v58 = vpop.eup %617 }
 0x2b4   :  { %v457_v59 = vld [vmem:[#allocation8] sm:$0xff] }
 0x2b5   :  { %458 = vst [vmem:[%s796_s7] sm:$0xff] %v457_v59 }
 0x2b6   :  { %464 = vsyncpa [#allocation4], 1 }
 0x2b7   :  { %465 = vsyncpa [#allocation6], 1 }

</bundles_post_ra>
